<compile_context>
chip_gen: v7x
topology: tpu7x:2x2x1
jax: 0.10.0
libtpu: 0.0.40
codegen_flags: <defaults>
</compile_context>

<pallas_src>
import functools

import jax
import jax.numpy as jnp
from jax import lax
from jax.experimental import pallas as pl
from jax.experimental.pallas import tpu as pltpu


INPUT_SIZE = 28
HIDDEN_SIZE = 128
OUTPUT_SIZE = 10
LANE = 128
SUBLANE_BF16 = 16          # bf16 packs 16 sublanes per vreg


def _round_up(n, m):
    return (n + m - 1) // m * m


def rnn_kernel(x_ref, wih_ref, whh_ref, bias_ref, wout_ref, bout_ref,
               out_ref, px_ref, *, seq_len, batch):
    """Whole RNN forward in one invocation.

    x_ref:    (T*Bp, F)  bf16, time-major, batch-padded, flattened over (T, Bp)
    wih_ref:  (F, H)     bf16, W_ih^T
    whh_ref:  (H, H)     bf16, W_hh^T
    bias_ref: (1, H)     f32,  b_ih + b_hh (fused)
    wout_ref: (H, Op)    bf16, W_out^T lane-padded to Op = 128
    bout_ref: (1, Op)    f32,  b_out lane-padded
    out_ref:  (Bp, Op)   f32,  lane-dense logits slab; sliced to (B, O) outside
    px_ref:   (T*Bp, H)  f32 VMEM scratch, hoisted input projection
    """
    # Input projection for ALL timesteps as one bf16 MXU matmul (f32 acc),
    # hoisted off the serial recurrence; fused bias folded in.  Materialized
    # in VMEM scratch so only one (Bp,H) slice is live per step.
    px_ref[...] = (jnp.dot(x_ref[...], wih_ref[...],
                           preferred_element_type=jnp.float32)
                   + bias_ref[...])

    whh = whh_ref[...]                                   # (H, H) bf16, loaded once
    h0 = jnp.zeros((batch, whh.shape[1]), jnp.float32)   # h0 = 0, f32 carry

    def step_at(start, h):
        px_t = px_ref[pl.ds(start, batch), :]            # (Bp, H) f32
        # Only this bf16 (Bp,H)@(H,H) dot + tanh remain on the serial path.
        return jnp.tanh(px_t + jnp.dot(h.astype(jnp.bfloat16), whh,
                                       preferred_element_type=jnp.float32))

    if seq_len <= 16:
        # Small T: fully static unroll, static sublane-aligned slice offsets.
        h = h0
        for t in range(seq_len):
            h = step_at(t * batch, h)
    else:
        # Large T: bounded unroll keeps vreg pressure / schedule window sane.
        def body(t, h):
            return step_at(pl.multiple_of(t * batch, batch), h)
        h = lax.fori_loop(0, seq_len, body, h0, unroll=8)

    # Final Linear on the last hidden state, written lane-dense (Op = 128).
    out_ref[...] = (jnp.dot(h.astype(jnp.bfloat16), wout_ref[...],
                            preferred_element_type=jnp.float32)
                    + bout_ref[...])


def _vmem_limit_bytes(T, Bp, F, H, Op):
    """Scoped-VMEM request sized from the actual resident footprint."""
    resident = (T * Bp * F * 2        # x (bf16)
                + F * H * 2           # W_ih^T (bf16)
                + H * H * 2           # W_hh^T (bf16)
                + H * 4               # fused bias (f32)
                + H * Op * 2          # W_out^T (bf16)
                + Op * 4              # b_out (f32)
                + Bp * Op * 4         # out (f32)
                + T * Bp * H * 4)     # px scratch (f32)
    limit = 2 * resident + (2 << 20)              # margin for compiler scratch
    return int(min(max(limit, 32 << 20), 64 << 20))   # stay within v7x physical


def rnn_forward(x, w_ih, w_hh, b_ih, b_hh, w_out, b_out):
    """x: (B, T, 28) batch_first, like the PyTorch module. Returns (B, 10)."""
    B, T, F = x.shape
    H = w_hh.shape[0]
    O = w_out.shape[0]

    Bp = _round_up(max(B, SUBLANE_BF16), SUBLANE_BF16)   # bf16 sublane packing
    Op = _round_up(max(O, LANE), LANE)                   # lane-dense output width

    # Glue (layout plumbing only): time-major, batch-padded, flattened input;
    # pre-transposed bf16 weights; fused f32 bias; lane-padded output proj.
    x_tm = jnp.transpose(x.astype(jnp.float32), (1, 0, 2))         # (T, B, F)
    if Bp != B:
        x_tm = jnp.pad(x_tm, ((0, 0), (0, Bp - B), (0, 0)))
    x2d = x_tm.reshape(T * Bp, F).astype(jnp.bfloat16)             # (T*Bp, F)

    wih_t = jnp.transpose(w_ih).astype(jnp.bfloat16)               # (F, H)
    whh_t = jnp.transpose(w_hh).astype(jnp.bfloat16)               # (H, H)
    bias = (b_ih + b_hh).reshape(1, H).astype(jnp.float32)         # (1, H)

    wout_t = jnp.transpose(w_out).astype(jnp.bfloat16)             # (H, O)
    wout_p = jnp.pad(wout_t, ((0, 0), (0, Op - O)))                # (H, Op)
    bout_p = jnp.pad(b_out.reshape(1, O).astype(jnp.float32),
                     ((0, 0), (0, Op - O)))                        # (1, Op)

    kernel = functools.partial(rnn_kernel, seq_len=T, batch=Bp)
    vmem = pl.BlockSpec(memory_space=pltpu.MemorySpace.VMEM)       # whole array in VMEM

    out_pad = pl.pallas_call(
        kernel,
        out_shape=jax.ShapeDtypeStruct((Bp, Op), jnp.float32),
        in_specs=[vmem] * 6,
        out_specs=pl.BlockSpec(memory_space=pltpu.MemorySpace.VMEM),
        scratch_shapes=[pltpu.VMEM((T * Bp, H), jnp.float32)],
        compiler_params=pltpu.CompilerParams(
            vmem_limit_bytes=_vmem_limit_bytes(T, Bp, F, H, Op)),
    )(x2d, wih_t, whh_t, bias, wout_p, bout_p)

    return out_pad[:B, :O]


def rnn_reference(x, w_ih, w_hh, b_ih, b_hh, w_out, b_out):
    """Pure-JAX f32 reference matching torch.nn.RNN(tanh) + Linear semantics."""
    B = x.shape[0]
    h0 = jnp.zeros((B, HIDDEN_SIZE), jnp.float32)

    def step(h, x_t):
        h_new = jnp.tanh(x_t @ w_ih.T + b_ih + h @ w_hh.T + b_hh)
        return h_new, None

    x_tm = jnp.transpose(x, (1, 0, 2))
    h_last, _ = lax.scan(step, h0, x_tm)
    return h_last @ w_out.T + b_out


if __name__ == "__main__":
    key = jax.random.PRNGKey(0)
    k_x, k1, k2, k3, k4, k5, k6 = jax.random.split(key, 7)

    B, T = 2, 8  # small batch / sequence; feature dims fixed by the module

    # Deterministic parameter init (uniform(-1/sqrt(H), 1/sqrt(H)), like PyTorch).
    bound = 1.0 / jnp.sqrt(jnp.float32(HIDDEN_SIZE))
    w_ih = jax.random.uniform(k1, (HIDDEN_SIZE, INPUT_SIZE), jnp.float32, -bound, bound)
    w_hh = jax.random.uniform(k2, (HIDDEN_SIZE, HIDDEN_SIZE), jnp.float32, -bound, bound)
    b_ih = jax.random.uniform(k3, (HIDDEN_SIZE,), jnp.float32, -bound, bound)
    b_hh = jax.random.uniform(k4, (HIDDEN_SIZE,), jnp.float32, -bound, bound)
    w_out = jax.random.uniform(k5, (OUTPUT_SIZE, HIDDEN_SIZE), jnp.float32, -bound, bound)
    b_out = jax.random.uniform(k6, (OUTPUT_SIZE,), jnp.float32, -bound, bound)

    x = jax.random.normal(k_x, (B, T, INPUT_SIZE), jnp.float32)

    out = rnn_forward(x, w_ih, w_hh, b_ih, b_hh, w_out, b_out)
    out = jax.block_until_ready(out)

    ref = rnn_reference(x, w_ih, w_hh, b_ih, b_hh, w_out, b_out)
    assert out.shape == (B, OUTPUT_SIZE)
    # Loosened tolerance: kernel feeds the MXU bf16 operands (f32 accumulation),
    # the reference is pure f32.
    assert jnp.allclose(out, ref, atol=4e-2, rtol=4e-2), "mismatch vs reference"

    print("KERNEL_OK")
</pallas_src>

<mosaic_0001>
module attributes {stable_mosaic.version = 11 : i64} {
  func.func @rnn_kernel(%arg0: memref<128x28xbf16, #tpu.memory_space<vmem>>, %arg1: memref<28x128xbf16, #tpu.memory_space<vmem>>, %arg2: memref<128x128xbf16, #tpu.memory_space<vmem>>, %arg3: memref<1x128xf32, #tpu.memory_space<vmem>>, %arg4: memref<128x128xbf16, #tpu.memory_space<vmem>>, %arg5: memref<1x128xf32, #tpu.memory_space<vmem>>, %arg6: memref<16x128xf32, #tpu.memory_space<vmem>>, %arg7: memref<128x128xf32, #tpu.memory_space<vmem>>) attributes {dimension_semantics = [], scalar_prefetch = 0 : i64, scratch_operands = 1 : i64, tpu.core_type = #tpu.core_type<tc>} {
    %c0 = arith.constant 0 : index
    %c0_0 = arith.constant 0 : index
    %0 = vector.load %arg0[%c0, %c0_0] : memref<128x28xbf16, #tpu.memory_space<vmem>>, vector<128x28xbf16>
    %c0_1 = arith.constant 0 : index
    %c0_2 = arith.constant 0 : index
    %1 = vector.load %arg1[%c0_1, %c0_2] : memref<28x128xbf16, #tpu.memory_space<vmem>>, vector<28x128xbf16>
    %cst = arith.constant dense<0.000000e+00> : vector<128x128xf32>
    %2 = tpu.matmul %0, %1, %cst {dimension_numbers = #tpu.dot_dimension_numbers<[1], [0], [0], [1], [0, 0, 1, 1], [], []>} : vector<128x28xbf16>, vector<28x128xbf16>, vector<128x128xf32> -> vector<128x128xf32>
    %c0_3 = arith.constant 0 : index
    %c0_4 = arith.constant 0 : index
    %3 = vector.load %arg3[%c0_3, %c0_4] : memref<1x128xf32, #tpu.memory_space<vmem>>, vector<1x128xf32>
    %4 = vector.broadcast %3 : vector<1x128xf32> to vector<128x128xf32>
    %5 = arith.addf %2, %4 : vector<128x128xf32>
    %c0_5 = arith.constant 0 : index
    %c0_6 = arith.constant 0 : index
    %6 = vector.load %arg7[%c0_5, %c0_6] : memref<128x128xf32, #tpu.memory_space<vmem>>, vector<128x128xf32>
    tpu.vector_store %arg7[%c0_5, %c0_6], %5 {strides = array<i32>} : memref<128x128xf32, #tpu.memory_space<vmem>>, vector<128x128xf32>,
    %c0_7 = arith.constant 0 : index
    %c0_8 = arith.constant 0 : index
    %7 = vector.load %arg2[%c0_7, %c0_8] : memref<128x128xbf16, #tpu.memory_space<vmem>>, vector<128x128xbf16>
    %cst_9 = arith.constant 0.000000e+00 : f32
    %8 = vector.broadcast %cst_9 : f32 to vector<16x128xf32>
    %c0_10 = arith.constant 0 : index
    %c0_11 = arith.constant 0 : index
    %9 = vector.load %arg7[%c0_10, %c0_11] : memref<128x128xf32, #tpu.memory_space<vmem>>, vector<16x128xf32>
    %10 = arith.truncf %8 : vector<16x128xf32> to vector<16x128xbf16>
    %cst_12 = arith.constant dense<0.000000e+00> : vector<16x128xf32>
    %11 = tpu.matmul %10, %7, %cst_12 {dimension_numbers = #tpu.dot_dimension_numbers<[1], [0], [0], [1], [0, 0, 1, 1], [], []>} : vector<16x128xbf16>, vector<128x128xbf16>, vector<16x128xf32> -> vector<16x128xf32>
    %12 = arith.addf %9, %11 : vector<16x128xf32>
    %13 = math.tanh %12 : vector<16x128xf32>
    %c16 = arith.constant 16 : index
    %c0_13 = arith.constant 0 : index
    %14 = vector.load %arg7[%c16, %c0_13] : memref<128x128xf32, #tpu.memory_space<vmem>>, vector<16x128xf32>
    %15 = arith.truncf %13 : vector<16x128xf32> to vector<16x128xbf16>
    %cst_14 = arith.constant dense<0.000000e+00> : vector<16x128xf32>
    %16 = tpu.matmul %15, %7, %cst_14 {dimension_numbers = #tpu.dot_dimension_numbers<[1], [0], [0], [1], [0, 0, 1, 1], [], []>} : vector<16x128xbf16>, vector<128x128xbf16>, vector<16x128xf32> -> vector<16x128xf32>
    %17 = arith.addf %14, %16 : vector<16x128xf32>
    %18 = math.tanh %17 : vector<16x128xf32>
    %c32 = arith.constant 32 : index
    %c0_15 = arith.constant 0 : index
    %19 = vector.load %arg7[%c32, %c0_15] : memref<128x128xf32, #tpu.memory_space<vmem>>, vector<16x128xf32>
    %20 = arith.truncf %18 : vector<16x128xf32> to vector<16x128xbf16>
    %cst_16 = arith.constant dense<0.000000e+00> : vector<16x128xf32>
    %21 = tpu.matmul %20, %7, %cst_16 {dimension_numbers = #tpu.dot_dimension_numbers<[1], [0], [0], [1], [0, 0, 1, 1], [], []>} : vector<16x128xbf16>, vector<128x128xbf16>, vector<16x128xf32> -> vector<16x128xf32>
    %22 = arith.addf %19, %21 : vector<16x128xf32>
    %23 = math.tanh %22 : vector<16x128xf32>
    %c48 = arith.constant 48 : index
    %c0_17 = arith.constant 0 : index
    %24 = vector.load %arg7[%c48, %c0_17] : memref<128x128xf32, #tpu.memory_space<vmem>>, vector<16x128xf32>
    %25 = arith.truncf %23 : vector<16x128xf32> to vector<16x128xbf16>
    %cst_18 = arith.constant dense<0.000000e+00> : vector<16x128xf32>
    %26 = tpu.matmul %25, %7, %cst_18 {dimension_numbers = #tpu.dot_dimension_numbers<[1], [0], [0], [1], [0, 0, 1, 1], [], []>} : vector<16x128xbf16>, vector<128x128xbf16>, vector<16x128xf32> -> vector<16x128xf32>
    %27 = arith.addf %24, %26 : vector<16x128xf32>
    %28 = math.tanh %27 : vector<16x128xf32>
    %c64 = arith.constant 64 : index
    %c0_19 = arith.constant 0 : index
    %29 = vector.load %arg7[%c64, %c0_19] : memref<128x128xf32, #tpu.memory_space<vmem>>, vector<16x128xf32>
    %30 = arith.truncf %28 : vector<16x128xf32> to vector<16x128xbf16>
    %cst_20 = arith.constant dense<0.000000e+00> : vector<16x128xf32>
    %31 = tpu.matmul %30, %7, %cst_20 {dimension_numbers = #tpu.dot_dimension_numbers<[1], [0], [0], [1], [0, 0, 1, 1], [], []>} : vector<16x128xbf16>, vector<128x128xbf16>, vector<16x128xf32> -> vector<16x128xf32>
    %32 = arith.addf %29, %31 : vector<16x128xf32>
    %33 = math.tanh %32 : vector<16x128xf32>
    %c80 = arith.constant 80 : index
    %c0_21 = arith.constant 0 : index
    %34 = vector.load %arg7[%c80, %c0_21] : memref<128x128xf32, #tpu.memory_space<vmem>>, vector<16x128xf32>
    %35 = arith.truncf %33 : vector<16x128xf32> to vector<16x128xbf16>
    %cst_22 = arith.constant dense<0.000000e+00> : vector<16x128xf32>
    %36 = tpu.matmul %35, %7, %cst_22 {dimension_numbers = #tpu.dot_dimension_numbers<[1], [0], [0], [1], [0, 0, 1, 1], [], []>} : vector<16x128xbf16>, vector<128x128xbf16>, vector<16x128xf32> -> vector<16x128xf32>
    %37 = arith.addf %34, %36 : vector<16x128xf32>
    %38 = math.tanh %37 : vector<16x128xf32>
    %c96 = arith.constant 96 : index
    %c0_23 = arith.constant 0 : index
    %39 = vector.load %arg7[%c96, %c0_23] : memref<128x128xf32, #tpu.memory_space<vmem>>, vector<16x128xf32>
    %40 = arith.truncf %38 : vector<16x128xf32> to vector<16x128xbf16>
    %cst_24 = arith.constant dense<0.000000e+00> : vector<16x128xf32>
    %41 = tpu.matmul %40, %7, %cst_24 {dimension_numbers = #tpu.dot_dimension_numbers<[1], [0], [0], [1], [0, 0, 1, 1], [], []>} : vector<16x128xbf16>, vector<128x128xbf16>, vector<16x128xf32> -> vector<16x128xf32>
    %42 = arith.addf %39, %41 : vector<16x128xf32>
    %43 = math.tanh %42 : vector<16x128xf32>
    %c112 = arith.constant 112 : index
    %c0_25 = arith.constant 0 : index
    %44 = vector.load %arg7[%c112, %c0_25] : memref<128x128xf32, #tpu.memory_space<vmem>>, vector<16x128xf32>
    %45 = arith.truncf %43 : vector<16x128xf32> to vector<16x128xbf16>
    %cst_26 = arith.constant dense<0.000000e+00> : vector<16x128xf32>
    %46 = tpu.matmul %45, %7, %cst_26 {dimension_numbers = #tpu.dot_dimension_numbers<[1], [0], [0], [1], [0, 0, 1, 1], [], []>} : vector<16x128xbf16>, vector<128x128xbf16>, vector<16x128xf32> -> vector<16x128xf32>
    %47 = arith.addf %44, %46 : vector<16x128xf32>
    %48 = math.tanh %47 : vector<16x128xf32>
    %49 = arith.truncf %48 : vector<16x128xf32> to vector<16x128xbf16>
    %c0_27 = arith.constant 0 : index
    %c0_28 = arith.constant 0 : index
    %50 = vector.load %arg4[%c0_27, %c0_28] : memref<128x128xbf16, #tpu.memory_space<vmem>>, vector<128x128xbf16>
    %cst_29 = arith.constant dense<0.000000e+00> : vector<16x128xf32>
    %51 = tpu.matmul %49, %50, %cst_29 {dimension_numbers = #tpu.dot_dimension_numbers<[1], [0], [0], [1], [0, 0, 1, 1], [], []>} : vector<16x128xbf16>, vector<128x128xbf16>, vector<16x128xf32> -> vector<16x128xf32>
    %c0_30 = arith.constant 0 : index
    %c0_31 = arith.constant 0 : index
    %52 = vector.load %arg5[%c0_30, %c0_31] : memref<1x128xf32, #tpu.memory_space<vmem>>, vector<1x128xf32>
    %53 = vector.broadcast %52 : vector<1x128xf32> to vector<16x128xf32>
    %54 = arith.addf %51, %53 : vector<16x128xf32>
    %c0_32 = arith.constant 0 : index
    %c0_33 = arith.constant 0 : index
    %55 = vector.load %arg6[%c0_32, %c0_33] : memref<16x128xf32, #tpu.memory_space<vmem>>, vector<16x128xf32>
    tpu.vector_store %arg6[%c0_32, %c0_33], %54 {strides = array<i32>} : memref<16x128xf32, #tpu.memory_space<vmem>>, vector<16x128xf32>,
    return
  }
}

</mosaic_0001>

<bundles_post_ra>
// kernel: tpu_custom_call.1
= control target key start
LH: loop header
LB: loop body
LE: loop exit
PB: predicated region body
PF: predicated region fallthrough
CT: control target
= control target key end

     0   :  { %11 = vsyncpa [#allocation4], 0  ;;  %s1641_s0 = inlined_call_operand.vmem [shape: bf16[128,28], index: 0, kind: input, shape index: {}]   ;;  %s1642_s1 = inlined_call_operand.vmem [shape: bf16[28,128], index: 1, kind: input, shape index: {}]   ;;  %s1643_s2 = inlined_call_operand.vmem [shape: bf16[128,128], index: 2, kind: input, shape index: {}]   ;;  %s1644_s3 = inlined_call_operand.vmem [shape: f32[1,128], index: 3, kind: input, shape index: {}]   ;;  %s1645_s4 = inlined_call_operand.hbm [shape: bf16[128,128], index: 4, kind: input, shape index: {}]   ;;  %s1646_s5 = inlined_call_operand.vmem [shape: f32[1,128], index: 5, kind: input, shape index: {}]   ;;  %s1647_s6 = inlined_call_operand.hbm [shape: f32[16,128], index: 6, kind: output, shape index: {}]  }
   0x1   :  { %12 = vsyncpa [#allocation5], 0  ;;  %s1281_s21 = smov [#allocation3]   ;;  %s1233_s25 = scalar_lea.hbm %s1645_s4, 1024 }
   0x2   :  { %s26_s22 = sshll.u32 %s1281_s21, 4  ;;  %p1234_p0 = scmp.ne.s32.totalorder %s1645_s4, %s1233_s25  ;;  %s27_s22 = int_to_ptr.vmem [resolvable:$true] %s26_s22 }
   0x3   :  { %p1237_p1 = scmp.lt.u32.totalorder %s1233_s25, %s1645_s4 }
   0x5   :  { %p1239_p2 = pnand %p1237_p1, %p1234_p0 }
   0x7   :  { %1242 = shalt.err (!%p1239_p2)
}
   0x8   :  { %s1243_s30 = scalar_lea.vmem %s27_s22, 1024  ;;  %p1248_p4 = scmp.lt.s32.totalorder %s27_s22, %s27_s22 }
   0x9   :  { %p1244_p3 = scmp.ne.s32.totalorder %s27_s22, %s1243_s30  ;;  %p1249_p5 = scmp.lt.s32.totalorder %s1243_s30, %s1243_s30 }
   0xb   :  { %p1250_p6 = por %p1249_p5, %p1248_p4 }
   0xd   :  { %p1251_p7 = pnand %p1250_p6, %p1244_p3 }
   0xf   :  { %1254 = shalt.err (!%p1251_p7)
}
  0x10   :  { %s1282_s7 = smov 64   ;;  %s1283_s8 = smov 4  }
  0x11   :  { %32 = dma.hbm_to_vmem [thread:$0]  %s1645_s4, 1024, %s27_s22, [#allocation4], %s1282_s7, %s1282_s7, %s1283_s8  }
  0x12   :  { %1277 = dma.done.wait [#allocation4], 1024  }
  0x13   :  { %1278 = vsyncadd [#allocation4], 4294966272  ;;  %v1284_v0 = vmov 0.0   ;;  %vm1285_vm0 = vmmov 0   ;;  %v1343_v1 = vld [vmem:[%s1643_s2] sm:$0xff]   ;;  %v1349_v2 = vld [vmem:[%s1643_s2 + $0x8] sm:$0xff]  }
  0x14   :  { %985 = vmatprep.subr.bf16.mxu1 %v1284_v0  ;;  %1001 = vmatprep.mubr.msk.bf16.mxu1 %vm1285_vm0, %v1284_v0  ;;  %v1180_v3 = vld [vmem:[%s1642_s1] sm:$0xff]   ;;  %vm142_vm1 = vcmask 1045504   ;;  %v1359_v4 = vld [vmem:[%s1643_s2 + $0x10] sm:$0xff]   ;;  %vm117_vm2 = vcmask 228352   ;;  %v1182_v5 = vld [vmem:[%s1642_s1 + $0x8] sm:$0x3f]  }
  0x15   :  { %986 = vmatpush3.bf16.msra.mxu1 %v1343_v1  ;;  %965 = vmatprep.subr.bf16.mxu0 %v1180_v3  ;;  %v1183_v6 = vld [vmem:[%s1641_s0] sm:$0xff]   ;;  %v144_v7 = vsel %vm142_vm1, %v1182_v5, 0  ;;  %v1372_v8 = vld [vmem:[%s1643_s2 + $0x18] sm:$0xff]   ;;  %v1185_v9 = vld [vmem:[%s1641_s0 + $0x8] sm:$0xff]   ;;  %v1286_v16 = vmov 0   ;;  %s1287_s21 = smov [#allocation6]  }
  0x16   :  { %987 = vmatprep.subr.bf16.mxu1 %v1284_v0  ;;  %966 = vmatpush3.bf16.msra.mxu0 %v1180_v3  ;;  %v1187_v10 = vld [vmem:[%s1641_s0 + $0x10] sm:$0xff]   ;;  %v1385_v11 = vld [vmem:[%s1643_s2 + $0x20] sm:$0xff]   ;;  %v1394_v12 = vld [vmem:[%s1643_s2 + $0x28] sm:$0xff]   ;;  %s826_s22 = sshll.u32 %s1287_s21, 4  ;;  %s827_s22 = int_to_ptr.vmem [resolvable:$true] %s826_s22 }
  0x17   :  { %1165 = vmatprep.subr.msk.bf16.mxu0 %vm142_vm1, %v1182_v5  ;;  %969 = vmatprep.mubr.msk.bf16.mxu0 %vm117_vm2, %v1183_v6  ;;  %v1188_v13 = vld [vmem:[%s1641_s0 + $0x18] sm:$0xff]   ;;  %v1410_v14 = vld [vmem:[%s1643_s2 + $0x30] sm:$0xff]   ;;  %v1189_v17 = vld [vmem:[%s1641_s0 + $0x20] sm:$0xff]   ;;  %s1255_s23 = scalar_lea.vmem %s827_s22, 256  ;;  %p1260_p9 = scmp.lt.s32.totalorder %s827_s22, %s827_s22 }
  0x18   :  { %v1420_v15 = vld [vmem:[%s1643_s2 + $0x38] sm:$0xff]   ;;  %v1190_v18 = vld [vmem:[%s1641_s0 + $0x28] sm:$0xff]   ;;  %v1191_v19 = vld [vmem:[%s1641_s0 + $0x30] sm:$0xff]   ;;  %p1256_p8 = scmp.ne.s32.totalorder %s827_s22, %s1255_s23  ;;  %p1261_p10 = scmp.lt.s32.totalorder %s1255_s23, %s1255_s23 }
  0x19   :  { %988 = vmatpush3.bf16.msra.mxu1 %v1349_v2  ;;  %v1192_v20 = vld [vmem:[%s1641_s0 + $0x38] sm:$0xff]   ;;  %v1482_v29 = vld [vmem:[%s1644_s3] ss:$0 sm:$0xff] }
  0x1a   :  { %989 = vmatprep.subr.bf16.mxu1 %v1284_v0  ;;  %968 = vmatpush3.bf16.msra.mxu0 %v144_v7  ;;  %p1262_p11 = por %p1261_p10, %p1260_p9 }
  0x1b   :  { %1005 = vmatprep.subr.bf16.mxu0 %v1284_v0 }
  0x1c   :  { %p1263_p12 = pnand %p1262_p11, %p1256_p8 }
  0x1d   :  { %990 = vmatpush3.bf16.msra.mxu1 %v1359_v4  ;;  %970 = vmatmul.mubr.msk.bf16.vlgmr.msra.gmra.mrb[0].mxu0 %vm117_vm2, %v1185_v9 }
  0x1e   :  { %991 = vmatprep.subr.bf16.mxu1 %v1284_v0  ;;  %1006 = vmatpush3.bf16.msra.mxu0 %v1343_v1 }
  0x1f   :  { %973 = vmatprep.mubr.msk.bf16.mxu0 %vm117_vm2, %v1187_v10  ;;  %1007 = vmatprep.subr.bf16.mxu0 %v1284_v0 }
  0x21   :  { %992 = vmatpush3.bf16.msra.mxu1 %v1372_v8 }
  0x22   :  { %993 = vmatprep.subr.bf16.mxu1 %v1284_v0  ;;  %1008 = vmatpush3.bf16.msra.mxu0 %v1349_v2 }
  0x23   :  { %1009 = vmatprep.subr.bf16.mxu0 %v1284_v0 }
  0x25   :  { %994 = vmatpush3.bf16.msra.mxu1 %v1385_v11  ;;  %974 = vmatmul.mubr.msk.bf16.gmra.mrb[4].mxu0 %vm117_vm2, %v1188_v13 }
  0x26   :  { %995 = vmatprep.subr.bf16.mxu1 %v1284_v0  ;;  %1010 = vmatpush3.bf16.msra.mxu0 %v1359_v4 }
  0x27   :  { %1011 = vmatprep.subr.bf16.mxu0 %v1284_v0  ;;  %977 = vmatprep.mubr.msk.bf16.mxu0 %vm117_vm2, %v1189_v17 }
  0x29   :  { %996 = vmatpush3.bf16.msra.mxu1 %v1394_v12 }
  0x2a   :  { %997 = vmatprep.subr.bf16.mxu1 %v1284_v0  ;;  %1012 = vmatpush3.bf16.msra.mxu0 %v1372_v8 }
  0x2b   :  { %1013 = vmatprep.subr.bf16.mxu0 %v1284_v0 }
  0x2d   :  { %998 = vmatpush3.bf16.msra.mxu1 %v1410_v14  ;;  %978 = vmatmul.mubr.msk.bf16.gmra.mrb[8].mxu0 %vm117_vm2, %v1190_v18 }
  0x2e   :  { %999 = vmatprep.subr.bf16.mxu1 %v1284_v0  ;;  %1014 = vmatpush3.bf16.msra.mxu0 %v1385_v11 }
  0x2f   :  { %1015 = vmatprep.subr.bf16.mxu0 %v1284_v0  ;;  %981 = vmatprep.mubr.msk.bf16.mxu0 %vm117_vm2, %v1191_v19 }
  0x31   :  { %1000 = vmatpush3.bf16.msra.mxu1 %v1420_v15 }
  0x32   :  { %1025 = vmatprep.subr.bf16.mxu1 %v1284_v0  ;;  %1016 = vmatpush3.bf16.msra.mxu0 %v1394_v12 }
  0x33   :  { %1017 = vmatprep.subr.bf16.mxu0 %v1284_v0 }
  0x34   :  { %1002 = vmatmul.mubr.bf16.vlgmr.msra.gmra.mrb[0].mxu1 %v1286_v16 }
  0x35   :  { %1026 = vmatpush3.bf16.msra.mxu1 %v1343_v1  ;;  %1041 = vmatprep.mubr.msk.bf16.mxu1 %vm1285_vm0, %v1284_v0 }
  0x36   :  { %1027 = vmatprep.subr.bf16.mxu1 %v1284_v0  ;;  %1018 = vmatpush3.bf16.msra.mxu0 %v1410_v14 }
  0x37   :  { %1019 = vmatprep.subr.bf16.mxu0 %v1284_v0  ;;  %982 = vmatmul.mubr.msk.bf16.gmra.mrb[12].mxu0 %vm117_vm2, %v1192_v20 }
  0x38   :  { %1021 = vmatprep.mubr.msk.bf16.mxu0 %vm1285_vm0, %v1284_v0 }
  0x39   :  { %1028 = vmatpush3.bf16.msra.mxu1 %v1349_v2 }
  0x3a   :  { %1029 = vmatprep.subr.bf16.mxu1 %v1284_v0  ;;  %1020 = vmatpush3.bf16.msra.mxu0 %v1420_v15 }
  0x3b   :  { %1045 = vmatprep.subr.bf16.mxu0 %v1284_v0 }
  0x3d   :  { %1030 = vmatpush3.bf16.msra.mxu1 %v1359_v4 }
  0x3e   :  { %1031 = vmatprep.subr.bf16.mxu1 %v1284_v0 }
  0x41   :  { %1032 = vmatpush3.bf16.msra.mxu1 %v1372_v8 }
  0x42   :  { %1033 = vmatprep.subr.bf16.mxu1 %v1284_v0 }
  0x45   :  { %1034 = vmatpush3.bf16.msra.mxu1 %v1385_v11 }
  0x46   :  { %1035 = vmatprep.subr.bf16.mxu1 %v1284_v0 }
  0x49   :  { %1036 = vmatpush3.bf16.msra.mxu1 %v1394_v12 }
  0x4a   :  { %1037 = vmatprep.subr.bf16.mxu1 %v1284_v0 }
  0x4d   :  { %1038 = vmatpush3.bf16.msra.mxu1 %v1410_v14 }
  0x4e   :  { %1039 = vmatprep.subr.bf16.mxu1 %v1284_v0 }
  0x51   :  { %1040 = vmatpush3.bf16.msra.mxu1 %v1420_v15 }
  0x52   :  { %1065 = vmatprep.subr.bf16.mxu1 %v1284_v0 }
  0xf0   :  { %v971_v21 = vpop.f32.mrb[0].mxu0 }
  0xf1   :  { %v180_v22 = vpop.f32.mrb[1].mxu0  ;;  %v189_v49 = vadd.f32 %v971_v21, %v1482_v29 }
  0xf2   :  { %v972_v23 = vpop.f32.mrb[2].mxu0  ;;  %v181_v30 = vadd.f32 %v1482_v29, %v180_v22 }
  0xf3   :  { %v183_v24 = vpop.f32.mrb[3].mxu0  ;;  %v192_v51 = vadd.f32 %v972_v23, %v1482_v29 }
  0xf4   :  { %v184_v32 = vadd.f32 %v1482_v29, %v183_v24 }
  0xf8   :  { %v1471_v25 = vpop.f32.mrb[4].mxu0 }
  0xf9   :  { %v1473_v26 = vpop.f32.mrb[5].mxu0  ;;  %v205_v16 = vadd.f32 %v1471_v25, %v1482_v29 }
  0xfa   :  { %v1475_v27 = vpop.f32.mrb[6].mxu0  ;;  %v197_v60 = vadd.f32 %v1482_v29, %v1473_v26 }
  0xfb   :  { %v1477_v28 = vpop.f32.mrb[7].mxu0  ;;  %v208_v18 = vadd.f32 %v1475_v27, %v1482_v29 }
  0xfc   :  { %v200_v62 = vadd.f32 %v1482_v29, %v1477_v28 }
 0x100   :  { %v1504_v41 = vpop.f32.mrb[8].mxu0 }
 0x101   :  { %v1506_v42 = vpop.f32.mrb[9].mxu0 }
 0x102   :  { %v1508_v43 = vpop.f32.mrb[10].mxu0  ;;  %v213_v25 = vadd.f32 %v1482_v29, %v1506_v42 }
 0x103   :  { %v1510_v44 = vpop.f32.mrb[11].mxu0 }
 0x107   :  { %v359_v31 = vpop.f32.mrb[0].mxu1 }
 0x108   :  { %v366_v33 = vadd.f32 %v359_v31, %v181_v30  ;;  %v1003_v34 = vpop.f32.mrb[1].mxu1  ;;  %v216_v30 = vadd.f32 %v1482_v29, %v1510_v44 }
 0x109   :  { %v362_v35 = vpop.f32.mrb[2].mxu1 }
 0x10a   :  { %v367_v36 = vadd.f32 %v362_v35, %v184_v32  ;;  %v1004_v37 = vpop.f32.mrb[3].mxu1  ;;  %1201 = vtanh.f32 %v366_v33  ;;  %v1512_v45 = vpop.f32.mrb[12].mxu0 }
 0x10b   :  { %v1514_v46 = vpop.f32.mrb[13].mxu0 }
 0x10c   :  { %1203 = vtanh.f32 %v367_v36  ;;  %v1516_v47 = vpop.f32.mrb[14].mxu0 }
 0x10d   :  { %v1518_v48 = vpop.f32.mrb[15].mxu0 }
 0x114   :  { %v1202_v38 = vpop.eup %1201 }
 0x116   :  { %v1204_v39 = vpop.eup %1203 }
 0x117   :  { %v372_v40 = vpack.c.bf16 %v1204_v39, %v1202_v38 }
 0x119   :  { %1022 = vmatmul.mubr.bf16.vlgmr.msra.gmra.mrb[16].mxu0 %v372_v40 }
 0x11a   :  { %1046 = vmatpush3.bf16.msra.mxu0 %v1343_v1  ;;  %1061 = vmatprep.mubr.msk.bf16.mxu0 %vm1285_vm0, %v1284_v0 }
 0x11b   :  { %1047 = vmatprep.subr.bf16.mxu0 %v1284_v0 }
 0x11e   :  { %1048 = vmatpush3.bf16.msra.mxu0 %v1349_v2 }
 0x11f   :  { %1049 = vmatprep.subr.bf16.mxu0 %v1284_v0 }
 0x122   :  { %1050 = vmatpush3.bf16.msra.mxu0 %v1359_v4 }
 0x123   :  { %1051 = vmatprep.subr.bf16.mxu0 %v1284_v0 }
 0x126   :  { %1052 = vmatpush3.bf16.msra.mxu0 %v1372_v8 }
 0x127   :  { %1053 = vmatprep.subr.bf16.mxu0 %v1284_v0 }
 0x12a   :  { %1054 = vmatpush3.bf16.msra.mxu0 %v1385_v11 }
 0x12b   :  { %1055 = vmatprep.subr.bf16.mxu0 %v1284_v0 }
 0x12e   :  { %1056 = vmatpush3.bf16.msra.mxu0 %v1394_v12 }
 0x12f   :  { %1057 = vmatprep.subr.bf16.mxu0 %v1284_v0 }
 0x132   :  { %1058 = vmatpush3.bf16.msra.mxu0 %v1410_v14 }
 0x133   :  { %1059 = vmatprep.subr.bf16.mxu0 %v1284_v0 }
 0x136   :  { %1060 = vmatpush3.bf16.msra.mxu0 %v1420_v15 }
 0x137   :  { %1085 = vmatprep.subr.bf16.mxu0 %v1284_v0 }
 0x1ec   :  { %v407_v50 = vpop.f32.mrb[16].mxu0 }
 0x1ed   :  { %v414_v52 = vadd.f32 %v407_v50, %v189_v49  ;;  %v1023_v53 = vpop.f32.mrb[17].mxu0  ;;  %v1196_v49 = vld [vmem:[#allocation3 + $0x18] sm:$0xff]   ;;  %v229_v50 = vadd.f32 %v1482_v29, %v1514_v46  ;;  %v1198_v46 = vld [vmem:[#allocation3 + $0x28] sm:$0xff]  }
 0x1ee   :  { %v410_v54 = vpop.f32.mrb[18].mxu0 }
 0x1ef   :  { %v415_v55 = vadd.f32 %v410_v54, %v192_v51  ;;  %v1024_v56 = vpop.f32.mrb[19].mxu0  ;;  %1205 = vtanh.f32 %v414_v52  ;;  %v232_v52 = vadd.f32 %v1482_v29, %v1518_v48  ;;  %v1200_v48 = vld [vmem:[#allocation3 + $0x38] sm:$0xff]  }
 0x1f1   :  { %1207 = vtanh.f32 %v415_v55 }
 0x1f9   :  { %v1206_v57 = vpop.eup %1205 }
 0x1fb   :  { %v1208_v58 = vpop.eup %1207 }
 0x1fc   :  { %v420_v59 = vpack.c.bf16 %v1208_v58, %v1206_v57 }
 0x1fe   :  { %1042 = vmatmul.mubr.bf16.vlgmr.msra.gmra.mrb[4].mxu1 %v420_v59 }
 0x1ff   :  { %1066 = vmatpush3.bf16.msra.mxu1 %v1343_v1  ;;  %1081 = vmatprep.mubr.msk.bf16.mxu1 %vm1285_vm0, %v1284_v0 }
 0x200   :  { %1067 = vmatprep.subr.bf16.mxu1 %v1284_v0 }
 0x203   :  { %1068 = vmatpush3.bf16.msra.mxu1 %v1349_v2 }
 0x204   :  { %1069 = vmatprep.subr.bf16.mxu1 %v1284_v0 }
 0x207   :  { %1070 = vmatpush3.bf16.msra.mxu1 %v1359_v4 }
 0x208   :  { %1071 = vmatprep.subr.bf16.mxu1 %v1284_v0 }
 0x20b   :  { %1072 = vmatpush3.bf16.msra.mxu1 %v1372_v8 }
 0x20c   :  { %1073 = vmatprep.subr.bf16.mxu1 %v1284_v0 }
 0x20f   :  { %1074 = vmatpush3.bf16.msra.mxu1 %v1385_v11 }
 0x210   :  { %1075 = vmatprep.subr.bf16.mxu1 %v1284_v0 }
 0x213   :  { %1076 = vmatpush3.bf16.msra.mxu1 %v1394_v12 }
 0x214   :  { %1077 = vmatprep.subr.bf16.mxu1 %v1284_v0 }
 0x217   :  { %1078 = vmatpush3.bf16.msra.mxu1 %v1410_v14 }
 0x218   :  { %1079 = vmatprep.subr.bf16.mxu1 %v1284_v0 }
 0x21b   :  { %1080 = vmatpush3.bf16.msra.mxu1 %v1420_v15 }
 0x21c   :  { %1105 = vmatprep.subr.bf16.mxu1 %v1284_v0 }
 0x2d1   :  { %v455_v61 = vpop.f32.mrb[4].mxu1 }
 0x2d2   :  { %v462_v63 = vadd.f32 %v455_v61, %v197_v60  ;;  %v1043_v3 = vpop.f32.mrb[5].mxu1  ;;  %v1197_v61 = vld [vmem:[#allocation3 + $0x20] sm:$0xff]  }
 0x2d3   :  { %v458_v5 = vpop.f32.mrb[6].mxu1 }
 0x2d4   :  { %v463_v6 = vadd.f32 %v458_v5, %v200_v62  ;;  %v1044_v7 = vpop.f32.mrb[7].mxu1  ;;  %1209 = vtanh.f32 %v462_v63  ;;  %v1199_v62 = vld [vmem:[#allocation3 + $0x30] sm:$0xff]   ;;  %v237_v63 = vadd.f32 %v1512_v45, %v1482_v29  ;;  %v240_v5 = vadd.f32 %v1516_v47, %v1482_v29 }
 0x2d6   :  { %1211 = vtanh.f32 %v463_v6 }
 0x2de   :  { %v1210_v9 = vpop.eup %1209 }
 0x2e0   :  { %v1212_v10 = vpop.eup %1211 }
 0x2e1   :  { %v468_v13 = vpack.c.bf16 %v1212_v10, %v1210_v9 }
 0x2e3   :  { %1062 = vmatmul.mubr.bf16.vlgmr.msra.gmra.mrb[20].mxu0 %v468_v13 }
 0x2e4   :  { %1086 = vmatpush3.bf16.msra.mxu0 %v1343_v1  ;;  %1101 = vmatprep.mubr.msk.bf16.mxu0 %vm1285_vm0, %v1284_v0 }
 0x2e5   :  { %1087 = vmatprep.subr.bf16.mxu0 %v1284_v0 }
 0x2e8   :  { %1088 = vmatpush3.bf16.msra.mxu0 %v1349_v2 }
 0x2e9   :  { %1089 = vmatprep.subr.bf16.mxu0 %v1284_v0 }
 0x2ec   :  { %1090 = vmatpush3.bf16.msra.mxu0 %v1359_v4 }
 0x2ed   :  { %1091 = vmatprep.subr.bf16.mxu0 %v1284_v0 }
 0x2f0   :  { %1092 = vmatpush3.bf16.msra.mxu0 %v1372_v8 }
 0x2f1   :  { %1093 = vmatprep.subr.bf16.mxu0 %v1284_v0 }
 0x2f4   :  { %1094 = vmatpush3.bf16.msra.mxu0 %v1385_v11 }
 0x2f5   :  { %1095 = vmatprep.subr.bf16.mxu0 %v1284_v0 }
 0x2f8   :  { %1096 = vmatpush3.bf16.msra.mxu0 %v1394_v12 }
 0x2f9   :  { %1097 = vmatprep.subr.bf16.mxu0 %v1284_v0 }
 0x2fc   :  { %1098 = vmatpush3.bf16.msra.mxu0 %v1410_v14 }
 0x2fd   :  { %1099 = vmatprep.subr.bf16.mxu0 %v1284_v0 }
 0x300   :  { %1100 = vmatpush3.bf16.msra.mxu0 %v1420_v15 }
 0x301   :  { %1125 = vmatprep.subr.bf16.mxu0 %v1284_v0 }
 0x3b6   :  { %v503_v17 = vpop.f32.mrb[20].mxu0 }
 0x3b7   :  { %v510_v19 = vadd.f32 %v503_v17, %v205_v16  ;;  %v1063_v20 = vpop.f32.mrb[21].mxu0 }
 0x3b8   :  { %v506_v21 = vpop.f32.mrb[22].mxu0 }
 0x3b9   :  { %v511_v22 = vadd.f32 %v506_v21, %v208_v18  ;;  %v1064_v23 = vpop.f32.mrb[23].mxu0  ;;  %1213 = vtanh.f32 %v510_v19 }
 0x3bb   :  { %1215 = vtanh.f32 %v511_v22 }
 0x3c3   :  { %v1214_v24 = vpop.eup %1213 }
 0x3c5   :  { %v1216_v26 = vpop.eup %1215 }
 0x3c6   :  { %v516_v28 = vpack.c.bf16 %v1216_v26, %v1214_v24 }
 0x3c8   :  { %1082 = vmatmul.mubr.bf16.vlgmr.msra.gmra.mrb[8].mxu1 %v516_v28 }
 0x3c9   :  { %1106 = vmatpush3.bf16.msra.mxu1 %v1343_v1  ;;  %1121 = vmatprep.mubr.msk.bf16.mxu1 %vm1285_vm0, %v1284_v0 }
 0x3ca   :  { %1107 = vmatprep.subr.bf16.mxu1 %v1284_v0 }
 0x3cd   :  { %1108 = vmatpush3.bf16.msra.mxu1 %v1349_v2 }
 0x3ce   :  { %1109 = vmatprep.subr.bf16.mxu1 %v1284_v0 }
 0x3d1   :  { %1110 = vmatpush3.bf16.msra.mxu1 %v1359_v4 }
 0x3d2   :  { %1111 = vmatprep.subr.bf16.mxu1 %v1284_v0 }
 0x3d5   :  { %1112 = vmatpush3.bf16.msra.mxu1 %v1372_v8 }
 0x3d6   :  { %1113 = vmatprep.subr.bf16.mxu1 %v1284_v0 }
 0x3d9   :  { %1114 = vmatpush3.bf16.msra.mxu1 %v1385_v11 }
 0x3da   :  { %1115 = vmatprep.subr.bf16.mxu1 %v1284_v0 }
 0x3dd   :  { %1116 = vmatpush3.bf16.msra.mxu1 %v1394_v12 }
 0x3de   :  { %1117 = vmatprep.subr.bf16.mxu1 %v1284_v0 }
 0x3e1   :  { %1118 = vmatpush3.bf16.msra.mxu1 %v1410_v14 }
 0x3e2   :  { %1119 = vmatprep.subr.bf16.mxu1 %v1284_v0 }
 0x3e5   :  { %1120 = vmatpush3.bf16.msra.mxu1 %v1420_v15 }
 0x3e6   :  { %1145 = vmatprep.subr.bf16.mxu1 %v1284_v0 }
 0x49b   :  { %v551_v27 = vpop.f32.mrb[8].mxu1 }
 0x49c   :  { %v558_v31 = vadd.f32 %v551_v27, %v213_v25  ;;  %v1083_v32 = vpop.f32.mrb[9].mxu1 }
 0x49d   :  { %v554_v33 = vpop.f32.mrb[10].mxu1 }
 0x49e   :  { %v559_v34 = vadd.f32 %v554_v33, %v216_v30  ;;  %v1084_v35 = vpop.f32.mrb[11].mxu1  ;;  %1217 = vtanh.f32 %v558_v31 }
 0x4a0   :  { %1219 = vtanh.f32 %v559_v34 }
 0x4a8   :  { %v1218_v36 = vpop.eup %1217 }
 0x4aa   :  { %v1220_v37 = vpop.eup %1219 }
 0x4ab   :  { %v564_v38 = vpack.c.bf16 %v1220_v37, %v1218_v36 }
 0x4ad   :  { %1102 = vmatmul.mubr.bf16.vlgmr.msra.gmra.mrb[24].mxu0 %v564_v38 }
 0x4ae   :  { %1126 = vmatpush3.bf16.msra.mxu0 %v1343_v1  ;;  %1141 = vmatprep.mubr.msk.bf16.mxu0 %vm1285_vm0, %v1284_v0  ;;  %v221_v1 = vadd.f32 %v1504_v41, %v1482_v29  ;;  %v1194_v41 = vld [vmem:[#allocation3 + $0x8] sm:$0xff]  }
 0x4af   :  { %1127 = vmatprep.subr.bf16.mxu0 %v1284_v0 }
 0x4b2   :  { %1128 = vmatpush3.bf16.msra.mxu0 %v1349_v2 }
 0x4b3   :  { %1129 = vmatprep.subr.bf16.mxu0 %v1284_v0 }
 0x4b6   :  { %1130 = vmatpush3.bf16.msra.mxu0 %v1359_v4  ;;  %v224_v4 = vadd.f32 %v1508_v43, %v1482_v29  ;;  %v1195_v43 = vld [vmem:[#allocation3 + $0x10] sm:$0xff]  }
 0x4b7   :  { %1131 = vmatprep.subr.bf16.mxu0 %v1284_v0 }
 0x4ba   :  { %1132 = vmatpush3.bf16.msra.mxu0 %v1372_v8 }
 0x4bb   :  { %1133 = vmatprep.subr.bf16.mxu0 %v1284_v0 }
 0x4be   :  { %1134 = vmatpush3.bf16.msra.mxu0 %v1385_v11 }
 0x4bf   :  { %1135 = vmatprep.subr.bf16.mxu0 %v1284_v0 }
 0x4c2   :  { %1136 = vmatpush3.bf16.msra.mxu0 %v1394_v12 }
 0x4c3   :  { %1137 = vmatprep.subr.bf16.mxu0 %v1284_v0 }
 0x4c6   :  { %1138 = vmatpush3.bf16.msra.mxu0 %v1410_v14 }
 0x4c7   :  { %1139 = vmatprep.subr.bf16.mxu0 %v1284_v0 }
 0x4ca   :  { %1140 = vmatpush3.bf16.msra.mxu0 %v1420_v15  ;;  %v1193_v15 = vld [vmem:[#allocation3] sm:$0xff]  }
 0x580   :  { %v599_v2 = vpop.f32.mrb[24].mxu0 }
 0x581   :  { %v606_v8 = vadd.f32 %v599_v2, %v221_v1  ;;  %v1103_v11 = vpop.f32.mrb[25].mxu0 }
 0x582   :  { %v602_v39 = vpop.f32.mrb[26].mxu0 }
 0x583   :  { %v607_v40 = vadd.f32 %v602_v39, %v224_v4  ;;  %v1104_v12 = vpop.f32.mrb[27].mxu0  ;;  %1221 = vtanh.f32 %v606_v8 }
 0x585   :  { %1223 = vtanh.f32 %v607_v40 }
 0x58d   :  { %v1222_v42 = vpop.eup %1221 }
 0x58f   :  { %v1224_v14 = vpop.eup %1223 }
 0x590   :  { %v612_v44 = vpack.c.bf16 %v1224_v14, %v1222_v42 }
 0x592   :  { %1122 = vmatmul.mubr.bf16.vlgmr.msra.gmra.mrb[12].mxu1 %v612_v44 }
 0x593   :  { %1161 = vmatprep.mubr.msk.bf16.mxu1 %vm1285_vm0, %v1284_v0  ;;  %1146 = vmatpush3.bf16.msra.mxu1 %v1193_v15 }
 0x594   :  { %1147 = vmatprep.subr.bf16.mxu1 %v1284_v0 }
 0x597   :  { %1148 = vmatpush3.bf16.msra.mxu1 %v1194_v41 }
 0x598   :  { %1149 = vmatprep.subr.bf16.mxu1 %v1284_v0 }
 0x59b   :  { %1150 = vmatpush3.bf16.msra.mxu1 %v1195_v43 }
 0x59c   :  { %1151 = vmatprep.subr.bf16.mxu1 %v1284_v0 }
 0x59f   :  { %1152 = vmatpush3.bf16.msra.mxu1 %v1196_v49 }
 0x5a0   :  { %1153 = vmatprep.subr.bf16.mxu1 %v1284_v0 }
 0x5a3   :  { %1154 = vmatpush3.bf16.msra.mxu1 %v1197_v61 }
 0x5a4   :  { %1155 = vmatprep.subr.bf16.mxu1 %v1284_v0 }
 0x5a7   :  { %1156 = vmatpush3.bf16.msra.mxu1 %v1198_v46 }
 0x5a8   :  { %1157 = vmatprep.subr.bf16.mxu1 %v1284_v0 }
 0x5ab   :  { %1158 = vmatpush3.bf16.msra.mxu1 %v1199_v62 }
 0x5ac   :  { %1159 = vmatprep.subr.bf16.mxu1 %v1284_v0  ;;  %v865_v0 = vld [vmem:[%s1646_s5] ss:$0 sm:$0xff] }
 0x5af   :  { %1160 = vmatpush3.bf16.msra.mxu1 %v1200_v48 }
 0x665   :  { %v647_v51 = vpop.f32.mrb[12].mxu1 }
 0x666   :  { %v654_v53 = vadd.f32 %v647_v51, %v229_v50  ;;  %v1123_v54 = vpop.f32.mrb[13].mxu1 }
 0x667   :  { %v650_v55 = vpop.f32.mrb[14].mxu1 }
 0x668   :  { %v655_v56 = vadd.f32 %v650_v55, %v232_v52  ;;  %v1124_v57 = vpop.f32.mrb[15].mxu1  ;;  %1225 = vtanh.f32 %v654_v53 }
 0x66a   :  { %1227 = vtanh.f32 %v655_v56 }
 0x672   :  { %v1226_v58 = vpop.eup %1225 }
 0x674   :  { %v1228_v59 = vpop.eup %1227 }
 0x675   :  { %v660_v60 = vpack.c.bf16 %v1228_v59, %v1226_v58 }
 0x677   :  { %1142 = vmatmul.mubr.bf16.vlgmr.msra.gmra.mrb[28].mxu0 %v660_v60 }
 0x74a   :  { %v695_v3 = vpop.f32.mrb[28].mxu0 }
 0x74b   :  { %v702_v6 = vadd.f32 %v695_v3, %v237_v63  ;;  %v1143_v7 = vpop.f32.mrb[29].mxu0 }
 0x74c   :  { %v698_v9 = vpop.f32.mrb[30].mxu0 }
 0x74d   :  { %v703_v10 = vadd.f32 %v698_v9, %v240_v5  ;;  %v1144_v13 = vpop.f32.mrb[31].mxu0  ;;  %1229 = vtanh.f32 %v702_v6 }
 0x74f   :  { %1231 = vtanh.f32 %v703_v10 }
 0x757   :  { %v1230_v16 = vpop.eup %1229 }
 0x759   :  { %v1232_v17 = vpop.eup %1231 }
 0x75a   :  { %v706_v18 = vpack.c.bf16 %v1232_v17, %v1230_v16 }
 0x75c   :  { %1162 = vmatmul.mubr.bf16.vlgmr.msra.gmra.mrb[16].mxu1 %v706_v18 }
 0x82f   :  { %v812_v45 = vpop.f32.mrb[16].mxu1 }
 0x830   :  { %v813_v19 = vadd.f32 %v865_v0, %v812_v45  ;;  %v1163_v29 = vpop.f32.mrb[17].mxu1 }
 0x831   :  { %v815_v47 = vpop.f32.mrb[18].mxu1 }
 0x832   :  { %819 = vst [vmem:[#allocation6] sm:$0xff] %v813_v19  ;;  %v816_v20 = vadd.f32 %v865_v0, %v815_v47  ;;  %v1164_v21 = vpop.f32.mrb[19].mxu1 }
 0x834   :  { %820 = vst [vmem:[#allocation6 + $0x8] sm:$0xff] %v816_v20 }
 0x835   :  { %1266 = shalt.err (!%p1263_p12)
}
 0x836   :  { %s1267_s1 = scalar_lea.hbm %s1647_s6, 256 }
 0x837   :  { %p1268_p13 = scmp.ne.s32.totalorder %s1647_s6, %s1267_s1  ;;  %p1271_p0 = scmp.lt.u32.totalorder %s1267_s1, %s1647_s6 }
 0x839   :  { %p1273_p1 = pnand %p1271_p0, %p1268_p13 }
 0x83b   :  { %1276 = shalt.err (!%p1273_p1)
}
 0x83c   :  { %s1288_s29 = smov 128   ;;  %s1289_s30 = smov 8  }
 0x83d   :  { %832 = dma.vmem_to_hbm [thread:$0]  %s827_s22, 256, %s1647_s6, [#allocation5], %s1288_s29, %s1288_s29, %s1289_s30  }
 0x83e   :  { %1279 = dma.done.wait [#allocation5], 256  }
 0x83f   :  { %1280 = vsyncadd [#allocation5], 4294967040 }
 0x840   :  { %836 = vsyncpa [#allocation4], 1 }
 0x841   :  { %837 = vsyncpa [#allocation5], 1 }

</bundles_post_ra>
